<compile_context>
chip_gen: v7x
topology: tpu7x:2x2x1
jax: 0.10.0
libtpu: 0.0.40
codegen_flags: <defaults>
</compile_context>

<pallas_src>
import math
import jax
import jax.numpy as jnp
from jax.experimental import pallas as pl
from jax.experimental.pallas import tpu as pltpu


def _round_up(v, m):
    return (v + m - 1) // m * m


def _vmem_limit_bytes():
    # Generation-aware VMEM budget: ~60% of per-core capacity, capped at 100 MiB.
    # Conservative 64 MiB fallback (v7x-sized) if the query is unavailable.
    cap = 64 * 1024 * 1024
    try:
        info = pltpu.get_tpu_info()
        cap = int(getattr(info, "vmem_capacity_bytes", cap))
    except Exception:
        pass
    return max(32 * 1024 * 1024, min(int(cap * 0.6), 100 * 1024 * 1024))


# ----------------------------- kernels ---------------------------------------


def _decoder_kernel_acc(x_ref, w_ref, b_ref, o_ref, acc_ref):
    """Multi-K-step variant: f32 accumulator, bias added once at the last k."""
    k = pl.program_id(2)

    @pl.when(k == 0)
    def _():
        acc_ref[...] = jnp.zeros_like(acc_ref)

    # bf16 tiles straight from HBM; accumulate in f32 on the MXU.
    acc_ref[...] += jnp.dot(x_ref[...], w_ref[...],
                            preferred_element_type=jnp.float32)

    @pl.when(k == pl.num_programs(2) - 1)
    def _():
        o_ref[...] = (acc_ref[...] + b_ref[...]).astype(o_ref.dtype)


def _decoder_kernel_single_k(x_ref, w_ref, b_ref, o_ref):
    """Single-K-step variant: no accumulator scratch / no RMW traffic."""
    o_ref[...] = (jnp.dot(x_ref[...], w_ref[...],
                          preferred_element_type=jnp.float32)
                  + b_ref[...]).astype(o_ref.dtype)


# ----------------------------- wrapper ----------------------------------------


class PallasDecoder:
    """logits = x @ weight.T + bias, with weight/bias prepared once at init."""

    def __init__(self, weight, bias, *, compute_dtype=jnp.bfloat16,
                 out_dtype=None, tm=None, tn=None, tk=None):
        vocab, d_model = weight.shape
        self.vocab = vocab
        self.d_model = d_model
        self.compute_dtype = compute_dtype
        self.out_dtype = out_dtype
        self.vmem_limit = _vmem_limit_bytes()

        # ---- tile selection (lane dims stay 128-aligned -> unmasked stores) ----
        k_align = _round_up(d_model, 128)
        self.tk = tk if tk is not None else min(2048, k_align)

        if tn is not None:
            self.tn = tn
        else:
            n_align = _round_up(vocab, 128)
            t = min(1024, n_align)
            if t == n_align and n_align >= 256:
                # Keep >=2 N tiles so v7x can shard the grid across its 2 TCs.
                t = _round_up(pl.cdiv(n_align, 2), 128)
            self.tn = t

        # M tile cap; actual tm is clamped per call to the (padded) batch*seq.
        # Default tiles (256, 1024, 2048) in bf16 + f32 acc use ~13 MiB of VMEM
        # double-buffered, well inside the budget on v5e/v6e/v7x.
        self.tm_cap = tm if tm is not None else 256

        self.k_pad = _round_up(d_model, self.tk)
        self.n_pad = _round_up(vocab, self.tn)

        # ---- one-time parameter prep: cast + transpose + pad (NOT per forward) ----
        w = weight.astype(compute_dtype).T                       # (d_model, vocab)
        if (self.k_pad, self.n_pad) != (d_model, vocab):
            w = jnp.pad(w, ((0, self.k_pad - d_model), (0, self.n_pad - vocab)))
        self.w = w
        b = bias.astype(jnp.float32).reshape(1, vocab)
        if self.n_pad != vocab:
            b = jnp.pad(b, ((0, 0), (0, self.n_pad - vocab)))
        self.b = b

    def __call__(self, x):
        batch, seq, d_model = x.shape
        assert d_model == self.d_model
        out_dtype = self.out_dtype if self.out_dtype is not None else x.dtype

        M = batch * seq
        tm = min(self.tm_cap, _round_up(M, 8))
        m_pad = _round_up(M, tm)
        tn, tk = self.tn, self.tk

        # Only the (small) activation is padded per call.
        x2d = x.reshape(M, d_model).astype(self.compute_dtype)
        if (m_pad, self.k_pad) != (M, d_model):
            x2d = jnp.pad(x2d, ((0, m_pad - M), (0, self.k_pad - d_model)))

        m_t = m_pad // tm
        n_t = self.n_pad // tn
        k_t = self.k_pad // tk

        c_item = jnp.dtype(self.compute_dtype).itemsize
        o_item = jnp.dtype(out_dtype).itemsize
        flops = 2 * m_pad * self.k_pad * self.n_pad
        bytes_accessed = (x2d.size * c_item * n_t          # x re-read per N tile
                          + self.w.size * c_item * m_t     # W re-read per M tile
                          + self.b.size * 4 * m_t
                          + m_pad * self.n_pad * o_item)

        cost = pl.CostEstimate(flops=flops, transcendentals=0,
                               bytes_accessed=bytes_accessed)

        if k_t == 1:
            # Single K step: no accumulator, bias fused into the only store.
            out2d = pl.pallas_call(
                _decoder_kernel_single_k,
                out_shape=jax.ShapeDtypeStruct((m_pad, self.n_pad), out_dtype),
                grid_spec=pltpu.PrefetchScalarGridSpec(
                    num_scalar_prefetch=0,
                    grid=(m_t, n_t),
                    in_specs=[
                        pl.BlockSpec((tm, tk), lambda i, j: (i, 0)),      # x
                        pl.BlockSpec((tk, tn), lambda i, j: (0, j)),      # W (K, N)
                        pl.BlockSpec((1, tn), lambda i, j: (0, j)),       # bias
                    ],
                    out_specs=pl.BlockSpec((tm, tn), lambda i, j: (i, j)),
                ),
                compiler_params=pltpu.CompilerParams(
                    dimension_semantics=("parallel", "parallel"),
                    vmem_limit_bytes=self.vmem_limit),
                cost_estimate=cost,
            )(x2d, self.w, self.b)
        else:
            out2d = pl.pallas_call(
                _decoder_kernel_acc,
                out_shape=jax.ShapeDtypeStruct((m_pad, self.n_pad), out_dtype),
                grid_spec=pltpu.PrefetchScalarGridSpec(
                    num_scalar_prefetch=0,
                    grid=(m_t, n_t, k_t),
                    in_specs=[
                        pl.BlockSpec((tm, tk), lambda i, j, k: (i, k)),   # x
                        pl.BlockSpec((tk, tn), lambda i, j, k: (k, j)),   # W (K, N)
                        pl.BlockSpec((1, tn), lambda i, j, k: (0, j)),    # bias
                    ],
                    out_specs=pl.BlockSpec((tm, tn), lambda i, j, k: (i, j)),
                    scratch_shapes=[pltpu.VMEM((tm, tn), jnp.float32)],
                ),
                compiler_params=pltpu.CompilerParams(
                    dimension_semantics=("parallel", "parallel", "arbitrary"),
                    vmem_limit_bytes=self.vmem_limit),
                cost_estimate=cost,
            )(x2d, self.w, self.b)

        return out2d[:M, :self.vocab].reshape(batch, seq, self.vocab)


def decoder_forward(x, weight, bias, **kwargs):
    """Convenience one-shot API (prefer caching PallasDecoder for repeated calls)."""
    return PallasDecoder(weight, bias, **kwargs)(x)


# ----------------------------- demo / tests -----------------------------------


if __name__ == "__main__":
    key = jax.random.PRNGKey(0)

    def make_params(kw, kb, d_model, vocab):
        # Mirror nn.Linear default init: uniform(-1/sqrt(d_model), 1/sqrt(d_model)).
        bound = 1.0 / math.sqrt(d_model)
        weight = jax.random.uniform(kw, (vocab, d_model), minval=-bound,
                                    maxval=bound, dtype=jnp.float32)
        bias = jax.random.uniform(kb, (vocab,), minval=-bound,
                                  maxval=bound, dtype=jnp.float32)
        return weight, bias

    # --- Small shape matching the module's toy usage (single-K path) -----------
    batch, seq, d_model, vocab_size = 2, 8, 32, 64
    kx, kw, kb, key = jax.random.split(key, 4)
    weight, bias = make_params(kw, kb, d_model, vocab_size)
    x = jax.random.normal(kx, (batch, seq, d_model), dtype=jnp.float32)

    dec = PallasDecoder(weight, bias)          # one-time param prep
    logits = dec(x)
    jax.block_until_ready(logits)
    assert logits.shape == (batch, seq, vocab_size)
    assert logits.dtype == x.dtype

    # Reference with the same bf16-operand / f32-accumulate math as the MXU path.
    ref_bf16 = jnp.einsum(
        "bsd,vd->bsv",
        x.astype(jnp.bfloat16), weight.astype(jnp.bfloat16),
        preferred_element_type=jnp.float32) + bias
    assert jnp.allclose(logits, ref_bf16, atol=1e-3, rtol=1e-3)
    # Loose check vs. full-f32 reference (only bf16 operand rounding differs).
    ref_f32 = x @ weight.T + bias
    assert jnp.allclose(logits, ref_f32, atol=3e-2, rtol=3e-2)

    # --- Larger shape exercising M/N/K tiling, accumulator & N padding ---------
    b2, s2, d2, v2 = 2, 64, 256, 384           # M=128; N pads 384 -> 512
    kx2, kw2, kb2, key = jax.random.split(key, 4)
    w2, bi2 = make_params(kw2, kb2, d2, v2)
    x2 = jax.random.normal(kx2, (b2, s2, d2), dtype=jnp.float32)

    ref2 = jnp.einsum(
        "bsd,vd->bsv",
        x2.astype(jnp.bfloat16), w2.astype(jnp.bfloat16),
        preferred_element_type=jnp.float32) + bi2

    # (a) default tile selection: single K step, tn halves vocab into 2 N tiles.
    dec2 = PallasDecoder(w2, bi2)
    logits2 = dec2(x2)
    jax.block_until_ready(logits2)
    assert logits2.shape == (b2, s2, v2)
    assert jnp.allclose(logits2, ref2, atol=2e-3, rtol=2e-3)

    # (b) forced small tiles: multi-K accumulator path (2 K tiles, 2 N tiles).
    dec3 = PallasDecoder(w2, bi2, tm=128, tn=256, tk=128)
    logits3 = dec3(x2)
    jax.block_until_ready(logits3)
    assert jnp.allclose(logits3, ref2, atol=2e-3, rtol=2e-3)

    # (c) bf16 logits output option.
    logits_bf16 = PallasDecoder(w2, bi2, out_dtype=jnp.bfloat16)(x2)
    jax.block_until_ready(logits_bf16)
    assert logits_bf16.dtype == jnp.bfloat16
    assert jnp.allclose(logits_bf16.astype(jnp.float32), ref2, atol=3e-2, rtol=3e-2)

    print("KERNEL_OK")
</pallas_src>

<mosaic_0001>
module attributes {stable_mosaic.version = 11 : i64} {
  func.func @_decoder_kernel_single_k(%arg0: i32, %arg1: i32, %arg2: memref<16x128xbf16, #tpu.memory_space<vmem>>, %arg3: memref<128x128xbf16, #tpu.memory_space<vmem>>, %arg4: memref<1x128xf32, #tpu.memory_space<vmem>>, %arg5: memref<16x128xf32, #tpu.memory_space<vmem>>) attributes {dimension_semantics = [#tpu.dimension_semantics<parallel>, #tpu.dimension_semantics<parallel>], iteration_bounds = array<i64: 1, 1>, scalar_prefetch = 0 : i64, scratch_operands = 0 : i64, tpu.core_type = #tpu.core_type<tc>, window_params = [{transform_indices = @transform_0, window_bounds = array<i64: 16, 128>}, {transform_indices = @transform_1, window_bounds = array<i64: 128, 128>}, {transform_indices = @transform_2, window_bounds = array<i64: 1, 128>}, {transform_indices = @transform_3, window_bounds = array<i64: 16, 128>}]} {
    %c0 = arith.constant 0 : index
    %c0_0 = arith.constant 0 : index
    %0 = vector.load %arg2[%c0, %c0_0] : memref<16x128xbf16, #tpu.memory_space<vmem>>, vector<16x128xbf16>
    %c0_1 = arith.constant 0 : index
    %c0_2 = arith.constant 0 : index
    %1 = vector.load %arg3[%c0_1, %c0_2] : memref<128x128xbf16, #tpu.memory_space<vmem>>, vector<128x128xbf16>
    %cst = arith.constant dense<0.000000e+00> : vector<16x128xf32>
    %2 = tpu.matmul %0, %1, %cst {dimension_numbers = #tpu.dot_dimension_numbers<[1], [0], [0], [1], [0, 0, 1, 1], [], []>} : vector<16x128xbf16>, vector<128x128xbf16>, vector<16x128xf32> -> vector<16x128xf32>
    %c0_3 = arith.constant 0 : index
    %c0_4 = arith.constant 0 : index
    %3 = vector.load %arg4[%c0_3, %c0_4] : memref<1x128xf32, #tpu.memory_space<vmem>>, vector<1x128xf32>
    %4 = vector.broadcast %3 : vector<1x128xf32> to vector<16x128xf32>
    %5 = arith.addf %2, %4 : vector<16x128xf32>
    %c0_5 = arith.constant 0 : index
    %c0_6 = arith.constant 0 : index
    %6 = vector.load %arg5[%c0_5, %c0_6] : memref<16x128xf32, #tpu.memory_space<vmem>>, vector<16x128xf32>
    tpu.vector_store %arg5[%c0_5, %c0_6], %5 {strides = array<i32>} : memref<16x128xf32, #tpu.memory_space<vmem>>, vector<16x128xf32>,
    return
  }
  func.func @transform_0(%arg0: i32, %arg1: i32) -> (i32, i32) {
    %c0_i32 = arith.constant 0 : i32
    %c0_i32_0 = arith.constant 0 : i32
    return %arg0, %c0_i32 : i32, i32
  }
  func.func @transform_1(%arg0: i32, %arg1: i32) -> (i32, i32) {
    %c0_i32 = arith.constant 0 : i32
    %c0_i32_0 = arith.constant 0 : i32
    return %c0_i32, %arg1 : i32, i32
  }
  func.func @transform_2(%arg0: i32, %arg1: i32) -> (i32, i32) {
    %c0_i32 = arith.constant 0 : i32
    %c0_i32_0 = arith.constant 0 : i32
    return %c0_i32, %arg1 : i32, i32
  }
  func.func @transform_3(%arg0: i32, %arg1: i32) -> (i32, i32) {
    %c0_i32 = arith.constant 0 : i32
    return %arg0, %arg1 : i32, i32
  }
}

</mosaic_0001>

<bundles_post_ra>
// kernel: tpu_custom_call.1
= control target key start
LH: loop header
LB: loop body
LE: loop exit
PB: predicated region body
PF: predicated region fallthrough
CT: control target
= control target key end

     0   :  { %8 = vsyncpa [#allocation3], 0  ;;  %s381_s0 = inlined_call_operand.hbm [shape: bf16[16,128], index: 0, kind: input, shape index: {}]   ;;  %s382_s1 = inlined_call_operand.hbm [shape: bf16[128,128], index: 1, kind: input, shape index: {}]   ;;  %s383_s2 = inlined_call_operand.vmem [shape: f32[1,128], index: 2, kind: input, shape index: {}]   ;;  %s384_s3 = inlined_call_operand.hbm [shape: f32[16,128], index: 3, kind: output, shape index: {}]  }
   0x1   :  { %9 = vsyncpa [#allocation6], 0 }
   0x2   :  { %10 = vsyncpa [#allocation4], 0  ;;  %s313_s12 = smov [#allocation2]   ;;  %s241_s16 = scalar_lea.hbm %s381_s0, 128 }
   0x3   :  { %s16_s13 = sshll.u32 %s313_s12, 4  ;;  %p242_p0 = scmp.ne.s32.totalorder %s381_s0, %s241_s16  ;;  %s17_s13 = int_to_ptr.vmem [resolvable:$true] %s16_s13 }
   0x4   :  { %p245_p1 = scmp.lt.u32.totalorder %s241_s16, %s381_s0 }
   0x6   :  { %p247_p2 = pnand %p245_p1, %p242_p0 }
   0x8   :  { %250 = shalt.err (!%p247_p2)
}
   0x9   :  { %s251_s21 = scalar_lea.vmem %s17_s13, 128  ;;  %p256_p4 = scmp.lt.s32.totalorder %s17_s13, %s17_s13 }
   0xa   :  { %p252_p3 = scmp.ne.s32.totalorder %s17_s13, %s251_s21  ;;  %p257_p5 = scmp.lt.s32.totalorder %s251_s21, %s251_s21 }
   0xc   :  { %p258_p6 = por %p257_p5, %p256_p4 }
   0xe   :  { %p259_p7 = pnand %p258_p6, %p252_p3 }
  0x10   :  { %262 = shalt.err (!%p259_p7)
}
  0x11   :  { %s314_s22 = smov 64   ;;  %s315_s23 = smov 4  }
  0x12   :  { %22 = dma.hbm_to_vmem [thread:$0]  %s381_s0, 128, %s17_s13, [#allocation3], %s314_s22, %s314_s22, %s315_s23  }
  0x13   :  { %s316_s26 = smov [#allocation5]   ;;  %s263_s30 = scalar_lea.hbm %s382_s1, 1024 }
  0x14   :  { %s28_s27 = sshll.u32 %s316_s26, 4  ;;  %p264_p8 = scmp.ne.s32.totalorder %s382_s1, %s263_s30  ;;  %s29_s27 = int_to_ptr.vmem [resolvable:$true] %s28_s27 }
  0x15   :  { %p267_p9 = scmp.lt.u32.totalorder %s263_s30, %s382_s1 }
  0x17   :  { %p269_p10 = pnand %p267_p9, %p264_p8 }
  0x19   :  { %272 = shalt.err (!%p269_p10)
}
  0x1a   :  { %s273_s8 = scalar_lea.vmem %s29_s27, 1024  ;;  %p278_p12 = scmp.lt.s32.totalorder %s29_s27, %s29_s27 }
  0x1b   :  { %p274_p11 = scmp.ne.s32.totalorder %s29_s27, %s273_s8  ;;  %p279_p13 = scmp.lt.s32.totalorder %s273_s8, %s273_s8 }
  0x1d   :  { %p280_p0 = por %p279_p13, %p278_p12 }
  0x1f   :  { %p281_p1 = pnand %p280_p0, %p274_p11 }
  0x21   :  { %284 = shalt.err (!%p281_p1)
}
  0x22   :  { %34 = dma.hbm_to_vmem [thread:$0]  %s382_s1, 1024, %s29_s27, [#allocation6], %s314_s22, %s314_s22, %s315_s23  }
  0x23   :  { %307 = dma.done.wait [#allocation3], 128  }
  0x24   :  { %308 = vsyncadd [#allocation3], 4294967168 }
  0x25   :  { %309 = dma.done.wait [#allocation6], 1024  }
  0x26   :  { %310 = vsyncadd [#allocation6], 4294966272  ;;  %v317_v0 = vmov 0.0   ;;  %vm318_vm0 = vmmov 0   ;;  %v232_v1 = vld [vmem:[#allocation5] sm:$0xff]   ;;  %v233_v2 = vld [vmem:[#allocation5 + $0x8] sm:$0xff]  }
  0x27   :  { %203 = vmatprep.subr.bf16.mxu0 %v317_v0  ;;  %219 = vmatprep.mubr.msk.bf16.mxu0 %vm318_vm0, %v317_v0  ;;  %v234_v3 = vld [vmem:[#allocation5 + $0x10] sm:$0xff]   ;;  %v235_v4 = vld [vmem:[#allocation5 + $0x18] sm:$0xff]   ;;  %v236_v5 = vld [vmem:[#allocation5 + $0x20] sm:$0xff]   ;;  %s319_s11 = smov [#allocation7]  }
  0x28   :  { %204 = vmatpush3.bf16.msra.mxu0 %v232_v1  ;;  %v237_v6 = vld [vmem:[#allocation5 + $0x28] sm:$0xff]   ;;  %v238_v7 = vld [vmem:[#allocation5 + $0x30] sm:$0xff]   ;;  %v239_v8 = vld [vmem:[#allocation5 + $0x38] sm:$0xff]   ;;  %s171_s12 = sshll.u32 %s319_s11, 4  ;;  %s172_s12 = int_to_ptr.vmem [resolvable:$true] %s171_s12 }
  0x29   :  { %205 = vmatprep.subr.bf16.mxu0 %v317_v0  ;;  %v240_v9 = vld [vmem:[#allocation2] sm:$0xff]   ;;  %s285_s13 = scalar_lea.vmem %s172_s12, 256  ;;  %p290_p3 = scmp.lt.s32.totalorder %s172_s12, %s172_s12 }
  0x2a   :  { %v184_v10 = vld [vmem:[%s383_s2] ss:$0 sm:$0xff]  ;;  %p286_p2 = scmp.ne.s32.totalorder %s172_s12, %s285_s13  ;;  %p291_p4 = scmp.lt.s32.totalorder %s285_s13, %s285_s13 }
  0x2c   :  { %206 = vmatpush3.bf16.msra.mxu0 %v233_v2  ;;  %p292_p5 = por %p291_p4, %p290_p3 }
  0x2d   :  { %207 = vmatprep.subr.bf16.mxu0 %v317_v0 }
  0x2e   :  { %p293_p6 = pnand %p292_p5, %p286_p2 }
  0x30   :  { %208 = vmatpush3.bf16.msra.mxu0 %v234_v3 }
  0x31   :  { %209 = vmatprep.subr.bf16.mxu0 %v317_v0 }
  0x34   :  { %210 = vmatpush3.bf16.msra.mxu0 %v235_v4 }
  0x35   :  { %211 = vmatprep.subr.bf16.mxu0 %v317_v0 }
  0x38   :  { %212 = vmatpush3.bf16.msra.mxu0 %v236_v5 }
  0x39   :  { %213 = vmatprep.subr.bf16.mxu0 %v317_v0 }
  0x3c   :  { %214 = vmatpush3.bf16.msra.mxu0 %v237_v6 }
  0x3d   :  { %215 = vmatprep.subr.bf16.mxu0 %v317_v0 }
  0x40   :  { %216 = vmatpush3.bf16.msra.mxu0 %v238_v7 }
  0x41   :  { %217 = vmatprep.subr.bf16.mxu0 %v317_v0 }
  0x44   :  { %218 = vmatpush3.bf16.msra.mxu0 %v239_v8 }
  0x47   :  { %220 = vmatmul.mubr.bf16.vlgmr.msra.gmra.mrb[0].mxu0 %v240_v9 }
 0x11a   :  { %v157_v11 = vpop.f32.mrb[0].mxu0 }
 0x11b   :  { %v158_v12 = vadd.f32 %v184_v10, %v157_v11  ;;  %v221_v13 = vpop.f32.mrb[1].mxu0 }
 0x11c   :  { %v160_v14 = vpop.f32.mrb[2].mxu0 }
 0x11d   :  { %164 = vst [vmem:[#allocation7] sm:$0xff] %v158_v12  ;;  %v161_v15 = vadd.f32 %v184_v10, %v160_v14  ;;  %v222_v16 = vpop.f32.mrb[3].mxu0 }
 0x11f   :  { %165 = vst [vmem:[#allocation7 + $0x8] sm:$0xff] %v161_v15 }
 0x120   :  { %296 = shalt.err (!%p293_p6)
}
 0x121   :  { %s297_s15 = scalar_lea.hbm %s384_s3, 256 }
 0x122   :  { %p298_p7 = scmp.ne.s32.totalorder %s384_s3, %s297_s15  ;;  %p301_p8 = scmp.lt.u32.totalorder %s297_s15, %s384_s3 }
 0x124   :  { %p303_p9 = pnand %p301_p8, %p298_p7 }
 0x126   :  { %306 = shalt.err (!%p303_p9)
}
 0x127   :  { %s320_s20 = smov 128   ;;  %s321_s21 = smov 8  }
 0x128   :  { %177 = dma.vmem_to_hbm [thread:$0]  %s172_s12, 256, %s384_s3, [#allocation4], %s320_s20, %s320_s20, %s321_s21  }
 0x129   :  { %311 = dma.done.wait [#allocation4], 256  }
 0x12a   :  { %312 = vsyncadd [#allocation4], 4294967040 }
 0x12b   :  { %181 = vsyncpa [#allocation3], 1 }
 0x12c   :  { %182 = vsyncpa [#allocation6], 1 }
 0x12d   :  { %183 = vsyncpa [#allocation4], 1 }

</bundles_post_ra>
